<compile_context>
chip_gen: v5e
topology: v5e:2x2
jax: 0.10.0
libtpu: 0.0.40
codegen_flags: <defaults>
</compile_context>

<pallas_src>
import functools
import math

import jax
import jax.numpy as jnp
from jax.experimental import pallas as pl
from jax.experimental.pallas import tpu as pltpu


def _round_up(v, m):
    return (v + m - 1) // m * m


_SQRT_2_OVER_PI = math.sqrt(2.0 / math.pi)


def _adapter_kernel(x_ref, w1_ref, b1_ref, w2_ref, g2_ref, b2_ref, o_ref,
                    *, c_real, c_pad, gelu_approx):
    """One row tile of LN1 -> Linear -> GELU -> Linear -> residual -> LN2.

    LN1's affine and the residual scale are folded into w1/b1_row/w2 by the
    wrapper, so the kernel body is: 2 normalizations, 2 MXU matmuls, 1 GELU.
    """
    eps = 1e-5
    inv_c = 1.0 / c_real
    n_pad_lanes = c_pad - c_real

    x = x_ref[...].astype(jnp.float32)           # (TILE_N, C_pad); padded lanes are 0

    def ln_center(v):
        # Padded lanes of v are exactly zero, so the plain sum is the true sum.
        mu = jnp.sum(v, axis=-1, keepdims=True) * inv_c
        d = v - mu                               # padded lanes become -mu
        ssq = jnp.sum(d * d, axis=-1, keepdims=True)
        if n_pad_lanes:
            ssq = ssq - n_pad_lanes * (mu * mu)  # remove padded-lane contribution
        return d, ssq * inv_c

    # ---- LayerNorm 1 (affine folded into w1 / b1_row) ----
    d1, var1 = ln_center(x)
    xn = d1 * jax.lax.rsqrt(var1 + eps)          # padded lanes hit zero rows of w1

    # ---- fc: Linear(C->R) -> GELU -> Linear(R->C) (residual scale folded into w2) ----
    mm_dtype = w1_ref.dtype                      # bf16 (MXU-native, default) or f32
    h1 = jnp.dot(xn.astype(mm_dtype), w1_ref[...],
                 preferred_element_type=jnp.float32) + b1_ref[...]       # (TILE_N, R_pad)
    if gelu_approx:
        # tanh GELU: one EUP transcendental instead of the erf VPU polynomial
        g = 0.5 * h1 * (1.0 + jnp.tanh(_SQRT_2_OVER_PI
                                       * (h1 + 0.044715 * (h1 * h1 * h1))))
    else:
        g = 0.5 * h1 * (1.0 + jax.lax.erf(h1 * (1.0 / math.sqrt(2.0))))  # exact GELU
    h2 = jnp.dot(g.astype(mm_dtype), w2_ref[...],
                 preferred_element_type=jnp.float32)                     # (TILE_N, C_pad)

    # ---- dropout: identity in eval mode ----
    # TODO(synk): training-mode dropout (random mask + 1/(1-p) scaling) not implemented.

    # ---- scaled residual (scale already folded into w2) ----
    y = x + h2

    # ---- LayerNorm 2 ----
    d2, var2 = ln_center(y)
    out = d2 * jax.lax.rsqrt(var2 + eps) * g2_ref[...] + b2_ref[...]
    o_ref[...] = out.astype(o_ref.dtype)


def _vmem_limit_bytes():
    """Chip-aware scoped-VMEM limit (v5e/v6e: 128 MiB physical, v7x: 64 MiB)."""
    try:
        cap = int(pltpu.get_tpu_info().vmem_capacity_bytes)
    except Exception:
        cap = 64 * 1024 * 1024                   # conservative (v7x-sized) fallback
    return int(min(cap * 3 // 4, 96 * 1024 * 1024))


def _pick_tile_n(n_rows, c_pad, r_pad, w_itemsize, vmem_limit):
    """Rows per grid step, sized against the scoped-VMEM budget."""
    # Resident (single-buffered) weights + param rows.
    resident = 2 * c_pad * r_pad * w_itemsize + (3 * c_pad + r_pad) * 4
    budget = vmem_limit - resident - (4 << 20)   # slack for compiler scratch
    # Per-row live bytes: double-buffered in + out tiles (4*C f32), live f32
    # intermediates (~5*C + 3*R), plus the low-precision matmul operand copies.
    per_row = 4 * (4 * c_pad + 5 * c_pad + 3 * r_pad) + w_itemsize * (c_pad + r_pad)
    if budget < per_row * 8:
        # TODO(synk): when resident weights alone blow the budget (huge C/R on
        # v7x), add an R-tiled grid axis with a VMEM accumulator instead of
        # shrinking TILE_N below 256.
        tile = 8
    else:
        tile = min(2048, budget // per_row)
        tile = max(8, tile // 8 * 8)
        if tile >= 256:
            tile = tile // 256 * 256             # keep the 256-wide MXU M dim full
    tile = min(tile, _round_up(n_rows, 8))
    return max(8, int(tile))


def adapter_forward(x, params, *, tile_n=None, matmul_dtype=jnp.bfloat16,
                    gelu_approx=True):
    """x: (B, S, C) float32. params: dict of weights (see init_params)."""
    B, S, C = x.shape
    N = B * S
    R = params["w1"].shape[1]

    C_pad = _round_up(C, 128)                    # lane-dense activations / output
    R_pad = _round_up(R, 128)                    # lane-dense (N, R) intermediate
    w_itemsize = jnp.dtype(matmul_dtype).itemsize
    vmem_limit = _vmem_limit_bytes()

    if tile_n is None:
        tile_n = _pick_tile_n(N, C_pad, R_pad, w_itemsize, vmem_limit)
    tile_n = max(8, _round_up(int(tile_n), 8))
    N_pad = _round_up(N, tile_n)

    x2d = x.reshape(N, C)
    if N_pad != N or C_pad != C:
        x2d = jnp.pad(x2d, ((0, N_pad - N), (0, C_pad - C)))

    # Fold LN1's affine into the first matmul and the residual scale into the
    # second one (pure wrapper-side XLA work, saves full-width VPU ops in-kernel).
    g1 = params["ln1_w"].astype(jnp.float32)
    b1 = params["ln1_b"].astype(jnp.float32)
    w1f = params["w1"].astype(jnp.float32)                        # (C, R)
    w1 = g1[:, None] * w1f
    b1_row = (b1 @ w1f).reshape(1, R)
    w2 = params["scale"].astype(jnp.float32) * params["w2"].astype(jnp.float32)  # (R, C)

    if C_pad != C or R_pad != R:
        w1 = jnp.pad(w1, ((0, C_pad - C), (0, R_pad - R)))
        w2 = jnp.pad(w2, ((0, R_pad - R), (0, C_pad - C)))
        b1_row = jnp.pad(b1_row, ((0, 0), (0, R_pad - R)))
    w1 = w1.astype(matmul_dtype)                 # bf16 halves resident VMEM + DMA bytes
    w2 = w2.astype(matmul_dtype)

    def pad_row(v):
        v = v.reshape(1, C).astype(jnp.float32)
        if C_pad != C:
            v = jnp.pad(v, ((0, 0), (0, C_pad - C)))
        return v

    g2, b2 = pad_row(params["ln2_w"]), pad_row(params["ln2_b"])

    grid = (N_pad // tile_n,)
    kernel = functools.partial(_adapter_kernel, c_real=C, c_pad=C_pad,
                               gelu_approx=gelu_approx)

    itemsize = jnp.dtype(x.dtype).itemsize
    cost = pl.CostEstimate(
        flops=int(4 * N_pad * C_pad * R_pad + 20 * N_pad * C_pad),
        transcendentals=int(N_pad * R_pad),
        bytes_accessed=int(2 * N_pad * C_pad * itemsize
                           + 2 * C_pad * R_pad * w_itemsize
                           + (3 * C_pad + R_pad) * 4),
    )

    def build_and_run(use_buffered):
        def const_spec(shape):
            # Constant-index inputs are DMA'd once; one buffer is enough
            # (default double-buffering would waste resident VMEM).
            if use_buffered:
                return pl.BlockSpec(shape, lambda i: (0, 0),
                                    pipeline_mode=pl.Buffered(1))
            return pl.BlockSpec(shape, lambda i: (0, 0))

        return pl.pallas_call(
            kernel,
            out_shape=jax.ShapeDtypeStruct((N_pad, C_pad), x.dtype),
            grid=grid,
            in_specs=[
                pl.BlockSpec((tile_n, C_pad), lambda i: (i, 0)),  # x tile (double-buffered)
                const_spec((C_pad, R_pad)),                       # w1 (LN1 gamma folded)
                const_spec((1, R_pad)),                           # b1 @ w1 row
                const_spec((R_pad, C_pad)),                       # w2 (scale folded)
                const_spec((1, C_pad)),                           # ln2 gamma
                const_spec((1, C_pad)),                           # ln2 beta
            ],
            out_specs=pl.BlockSpec((tile_n, C_pad), lambda i: (i, 0)),
            compiler_params=pltpu.CompilerParams(
                dimension_semantics=("parallel",),                # shard row tiles on v7x TCs
                vmem_limit_bytes=vmem_limit,                      # chip-aware
            ),
            cost_estimate=cost,
        )(x2d, w1, b1_row, w2, g2, b2)

    try:
        out = build_and_run(True)
    except Exception:
        # Fallback for Pallas versions without pipeline_mode / single-buffering.
        out = build_and_run(False)

    return out[:N, :C].reshape(B, S, C)


def init_params(key, c_in, reduction=1.5):
    reduced_dim = max(16, int(c_in // reduction))
    k1, k2 = jax.random.split(key)
    # kaiming_normal_(nonlinearity='linear'): std = 1/sqrt(fan_in), fan_in = in_features
    w1_torch = jax.random.normal(k1, (reduced_dim, c_in), jnp.float32) / math.sqrt(c_in)
    w2_torch = jax.random.normal(k2, (c_in, reduced_dim), jnp.float32) / math.sqrt(reduced_dim)
    return {
        "w1": w1_torch.T,                              # (C, R) so the kernel does x @ W
        "w2": w2_torch.T,                              # (R, C)
        "ln1_w": jnp.ones((c_in,), jnp.float32),
        "ln1_b": jnp.zeros((c_in,), jnp.float32),
        "ln2_w": jnp.ones((c_in,), jnp.float32),
        "ln2_b": jnp.zeros((c_in,), jnp.float32),
        "scale": jnp.array(0.1, jnp.float32),
    }


def _reference(x, params, *, gelu_approx=True):
    """Plain-JAX reference for correctness checking (eval mode)."""
    eps = 1e-5

    def ln(v, g, b):
        mu = jnp.mean(v, axis=-1, keepdims=True)
        var = jnp.mean((v - mu) ** 2, axis=-1, keepdims=True)
        return (v - mu) * jax.lax.rsqrt(var + eps) * g + b

    h = ln(x, params["ln1_w"], params["ln1_b"])
    h1 = h @ params["w1"]
    if gelu_approx:
        g = 0.5 * h1 * (1.0 + jnp.tanh(_SQRT_2_OVER_PI * (h1 + 0.044715 * h1 ** 3)))
    else:
        g = 0.5 * h1 * (1.0 + jax.lax.erf(h1 / math.sqrt(2.0)))
    h2 = g @ params["w2"]
    y = x + params["scale"] * h2
    return ln(y, params["ln2_w"], params["ln2_b"])


if __name__ == "__main__":
    key = jax.random.PRNGKey(0)
    kx, kp, kx2, kp2, kln = jax.random.split(key, 5)

    # --- case 1: small shape, default fast path (bf16 MXU operands, tanh GELU) ---
    B, S, C = 2, 8, 32
    x = jax.random.normal(kx, (B, S, C), jnp.float32)
    params = init_params(kp, C, reduction=1.5)

    out = jax.block_until_ready(adapter_forward(x, params))
    ref = _reference(x, params, gelu_approx=True)
    assert out.shape == (B, S, C)
    assert jnp.allclose(out, ref, atol=2e-2, rtol=2e-2), "mismatch (case 1, bf16/tanh)"

    # --- case 2: non-multiple-of-128 C, multi-tile grid, exact f32 + erf path,
    #     non-trivial LN affines to exercise the LN1/scale folding ---
    B2, S2, C2 = 4, 100, 160
    x2 = jax.random.normal(kx2, (B2, S2, C2), jnp.float32)
    params2 = init_params(kp2, C2, reduction=1.5)
    ka, kb, kc, kd = jax.random.split(kln, 4)
    params2["ln1_w"] = 1.0 + 0.1 * jax.random.normal(ka, (C2,), jnp.float32)
    params2["ln1_b"] = 0.1 * jax.random.normal(kb, (C2,), jnp.float32)
    params2["ln2_w"] = 1.0 + 0.1 * jax.random.normal(kc, (C2,), jnp.float32)
    params2["ln2_b"] = 0.1 * jax.random.normal(kd, (C2,), jnp.float32)

    out2 = jax.block_until_ready(
        adapter_forward(x2, params2, tile_n=128,
                        matmul_dtype=jnp.float32, gelu_approx=False))
    ref2 = _reference(x2, params2, gelu_approx=False)
    assert out2.shape == (B2, S2, C2)
    assert jnp.allclose(out2, ref2, atol=1e-4, rtol=1e-4), "mismatch (case 2, f32/erf)"

    # --- case 3: default fast path on the padded / multi-tile shapes ---
    out3 = jax.block_until_ready(adapter_forward(x2, params2))
    ref3 = _reference(x2, params2, gelu_approx=True)
    assert jnp.allclose(out3, ref3, atol=3e-2, rtol=3e-2), "mismatch (case 3, bf16/tanh)"

    print("KERNEL_OK")
</pallas_src>

<mosaic_0001>
module attributes {stable_mosaic.version = 11 : i64} {
  func.func @_adapter_kernel(%arg0: i32, %arg1: memref<16x128xf32, #tpu.memory_space<vmem>>, %arg2: memref<128x128xbf16, #tpu.memory_space<vmem>>, %arg3: memref<1x128xf32, #tpu.memory_space<vmem>>, %arg4: memref<128x128xbf16, #tpu.memory_space<vmem>>, %arg5: memref<1x128xf32, #tpu.memory_space<vmem>>, %arg6: memref<1x128xf32, #tpu.memory_space<vmem>>, %arg7: memref<16x128xf32, #tpu.memory_space<vmem>>) attributes {dimension_semantics = [#tpu.dimension_semantics<parallel>], iteration_bounds = array<i64: 1>, scalar_prefetch = 0 : i64, scratch_operands = 0 : i64, tpu.core_type = #tpu.core_type<tc>, window_params = [{transform_indices = @transform_0, window_bounds = array<i64: 16, 128>}, {pipeline_mode = #tpu.pipeline_mode<synchronous>, transform_indices = @transform_1, window_bounds = array<i64: 128, 128>}, {pipeline_mode = #tpu.pipeline_mode<synchronous>, transform_indices = @transform_2, window_bounds = array<i64: 1, 128>}, {pipeline_mode = #tpu.pipeline_mode<synchronous>, transform_indices = @transform_3, window_bounds = array<i64: 128, 128>}, {pipeline_mode = #tpu.pipeline_mode<synchronous>, transform_indices = @transform_4, window_bounds = array<i64: 1, 128>}, {pipeline_mode = #tpu.pipeline_mode<synchronous>, transform_indices = @transform_5, window_bounds = array<i64: 1, 128>}, {transform_indices = @transform_6, window_bounds = array<i64: 16, 128>}]} {
    %c0 = arith.constant 0 : index
    %c0_0 = arith.constant 0 : index
    %0 = vector.load %arg1[%c0, %c0_0] : memref<16x128xf32, #tpu.memory_space<vmem>>, vector<16x128xf32>
    %cst = arith.constant dense<0.000000e+00> : vector<16xf32>
    %1 = vector.multi_reduction <add>, %0, %cst [1] : vector<16x128xf32> to vector<16xf32>
    %2 = vector.shape_cast %1 : vector<16xf32> to vector<16x1xf32>
    %cst_1 = arith.constant 3.125000e-02 : f32
    %3 = vector.broadcast %cst_1 : f32 to vector<16x1xf32>
    %4 = arith.mulf %2, %3 : vector<16x1xf32>
    %5 = vector.broadcast %4 : vector<16x1xf32> to vector<16x128xf32>
    %6 = arith.subf %0, %5 : vector<16x128xf32>
    %7 = arith.mulf %6, %6 : vector<16x128xf32>
    %cst_2 = arith.constant dense<0.000000e+00> : vector<16xf32>
    %8 = vector.multi_reduction <add>, %7, %cst_2 [1] : vector<16x128xf32> to vector<16xf32>
    %9 = vector.shape_cast %8 : vector<16xf32> to vector<16x1xf32>
    %10 = arith.mulf %4, %4 : vector<16x1xf32>
    %cst_3 = arith.constant 9.600000e+01 : f32
    %11 = vector.broadcast %cst_3 : f32 to vector<16x1xf32>
    %12 = arith.mulf %11, %10 : vector<16x1xf32>
    %13 = arith.subf %9, %12 : vector<16x1xf32>
    %cst_4 = arith.constant 3.125000e-02 : f32
    %14 = vector.broadcast %cst_4 : f32 to vector<16x1xf32>
    %15 = arith.mulf %13, %14 : vector<16x1xf32>
    %cst_5 = arith.constant 9.99999974E-6 : f32
    %16 = vector.broadcast %cst_5 : f32 to vector<16x1xf32>
    %17 = arith.addf %15, %16 : vector<16x1xf32>
    %18 = math.rsqrt %17 : vector<16x1xf32>
    %19 = vector.broadcast %18 : vector<16x1xf32> to vector<16x128xf32>
    %20 = arith.mulf %6, %19 : vector<16x128xf32>
    %21 = arith.truncf %20 : vector<16x128xf32> to vector<16x128xbf16>
    %c0_6 = arith.constant 0 : index
    %c0_7 = arith.constant 0 : index
    %22 = vector.load %arg2[%c0_6, %c0_7] : memref<128x128xbf16, #tpu.memory_space<vmem>>, vector<128x128xbf16>
    %cst_8 = arith.constant dense<0.000000e+00> : vector<16x128xf32>
    %23 = tpu.matmul %21, %22, %cst_8 {dimension_numbers = #tpu.dot_dimension_numbers<[1], [0], [0], [1], [0, 0, 1, 1], [], []>} : vector<16x128xbf16>, vector<128x128xbf16>, vector<16x128xf32> -> vector<16x128xf32>
    %c0_9 = arith.constant 0 : index
    %c0_10 = arith.constant 0 : index
    %24 = vector.load %arg3[%c0_9, %c0_10] : memref<1x128xf32, #tpu.memory_space<vmem>>, vector<1x128xf32>
    %25 = vector.broadcast %24 : vector<1x128xf32> to vector<16x128xf32>
    %26 = arith.addf %23, %25 : vector<16x128xf32>
    %cst_11 = arith.constant 5.000000e-01 : f32
    %27 = vector.broadcast %cst_11 : f32 to vector<16x128xf32>
    %28 = arith.mulf %27, %26 : vector<16x128xf32>
    %29 = arith.mulf %26, %26 : vector<16x128xf32>
    %30 = arith.mulf %29, %26 : vector<16x128xf32>
    %cst_12 = arith.constant 4.471500e-02 : f32
    %31 = vector.broadcast %cst_12 : f32 to vector<16x128xf32>
    %32 = arith.mulf %31, %30 : vector<16x128xf32>
    %33 = arith.addf %26, %32 : vector<16x128xf32>
    %cst_13 = arith.constant 0.797884583 : f32
    %34 = vector.broadcast %cst_13 : f32 to vector<16x128xf32>
    %35 = arith.mulf %34, %33 : vector<16x128xf32>
    %36 = math.tanh %35 : vector<16x128xf32>
    %cst_14 = arith.constant 1.000000e+00 : f32
    %37 = vector.broadcast %cst_14 : f32 to vector<16x128xf32>
    %38 = arith.addf %37, %36 : vector<16x128xf32>
    %39 = arith.mulf %28, %38 : vector<16x128xf32>
    %40 = arith.truncf %39 : vector<16x128xf32> to vector<16x128xbf16>
    %c0_15 = arith.constant 0 : index
    %c0_16 = arith.constant 0 : index
    %41 = vector.load %arg4[%c0_15, %c0_16] : memref<128x128xbf16, #tpu.memory_space<vmem>>, vector<128x128xbf16>
    %cst_17 = arith.constant dense<0.000000e+00> : vector<16x128xf32>
    %42 = tpu.matmul %40, %41, %cst_17 {dimension_numbers = #tpu.dot_dimension_numbers<[1], [0], [0], [1], [0, 0, 1, 1], [], []>} : vector<16x128xbf16>, vector<128x128xbf16>, vector<16x128xf32> -> vector<16x128xf32>
    %43 = arith.addf %0, %42 : vector<16x128xf32>
    %cst_18 = arith.constant dense<0.000000e+00> : vector<16xf32>
    %44 = vector.multi_reduction <add>, %43, %cst_18 [1] : vector<16x128xf32> to vector<16xf32>
    %45 = vector.shape_cast %44 : vector<16xf32> to vector<16x1xf32>
    %cst_19 = arith.constant 3.125000e-02 : f32
    %46 = vector.broadcast %cst_19 : f32 to vector<16x1xf32>
    %47 = arith.mulf %45, %46 : vector<16x1xf32>
    %48 = vector.broadcast %47 : vector<16x1xf32> to vector<16x128xf32>
    %49 = arith.subf %43, %48 : vector<16x128xf32>
    %50 = arith.mulf %49, %49 : vector<16x128xf32>
    %cst_20 = arith.constant dense<0.000000e+00> : vector<16xf32>
    %51 = vector.multi_reduction <add>, %50, %cst_20 [1] : vector<16x128xf32> to vector<16xf32>
    %52 = vector.shape_cast %51 : vector<16xf32> to vector<16x1xf32>
    %53 = arith.mulf %47, %47 : vector<16x1xf32>
    %cst_21 = arith.constant 9.600000e+01 : f32
    %54 = vector.broadcast %cst_21 : f32 to vector<16x1xf32>
    %55 = arith.mulf %54, %53 : vector<16x1xf32>
    %56 = arith.subf %52, %55 : vector<16x1xf32>
    %cst_22 = arith.constant 3.125000e-02 : f32
    %57 = vector.broadcast %cst_22 : f32 to vector<16x1xf32>
    %58 = arith.mulf %56, %57 : vector<16x1xf32>
    %cst_23 = arith.constant 9.99999974E-6 : f32
    %59 = vector.broadcast %cst_23 : f32 to vector<16x1xf32>
    %60 = arith.addf %58, %59 : vector<16x1xf32>
    %61 = math.rsqrt %60 : vector<16x1xf32>
    %62 = vector.broadcast %61 : vector<16x1xf32> to vector<16x128xf32>
    %63 = arith.mulf %49, %62 : vector<16x128xf32>
    %c0_24 = arith.constant 0 : index
    %c0_25 = arith.constant 0 : index
    %64 = vector.load %arg5[%c0_24, %c0_25] : memref<1x128xf32, #tpu.memory_space<vmem>>, vector<1x128xf32>
    %65 = vector.broadcast %64 : vector<1x128xf32> to vector<16x128xf32>
    %66 = arith.mulf %63, %65 : vector<16x128xf32>
    %c0_26 = arith.constant 0 : index
    %c0_27 = arith.constant 0 : index
    %67 = vector.load %arg6[%c0_26, %c0_27] : memref<1x128xf32, #tpu.memory_space<vmem>>, vector<1x128xf32>
    %68 = vector.broadcast %67 : vector<1x128xf32> to vector<16x128xf32>
    %69 = arith.addf %66, %68 : vector<16x128xf32>
    %c0_28 = arith.constant 0 : index
    %c0_29 = arith.constant 0 : index
    %70 = vector.load %arg7[%c0_28, %c0_29] : memref<16x128xf32, #tpu.memory_space<vmem>>, vector<16x128xf32>
    tpu.vector_store %arg7[%c0_28, %c0_29], %69 {strides = array<i32>} : memref<16x128xf32, #tpu.memory_space<vmem>>, vector<16x128xf32>,
    return
  }
  func.func @transform_0(%arg0: i32) -> (i32, i32) {
    %c0_i32 = arith.constant 0 : i32
    %c0_i32_0 = arith.constant 0 : i32
    return %arg0, %c0_i32 : i32, i32
  }
  func.func @transform_1(%arg0: i32) -> (i32, i32) {
    %c0_i32 = arith.constant 0 : i32
    %c0_i32_0 = arith.constant 0 : i32
    %c0_i32_1 = arith.constant 0 : i32
    return %c0_i32, %c0_i32_0 : i32, i32
  }
  func.func @transform_2(%arg0: i32) -> (i32, i32) {
    %c0_i32 = arith.constant 0 : i32
    %c0_i32_0 = arith.constant 0 : i32
    %c0_i32_1 = arith.constant 0 : i32
    return %c0_i32, %c0_i32_0 : i32, i32
  }
  func.func @transform_3(%arg0: i32) -> (i32, i32) {
    %c0_i32 = arith.constant 0 : i32
    %c0_i32_0 = arith.constant 0 : i32
    %c0_i32_1 = arith.constant 0 : i32
    return %c0_i32, %c0_i32_0 : i32, i32
  }
  func.func @transform_4(%arg0: i32) -> (i32, i32) {
    %c0_i32 = arith.constant 0 : i32
    %c0_i32_0 = arith.constant 0 : i32
    %c0_i32_1 = arith.constant 0 : i32
    return %c0_i32, %c0_i32_0 : i32, i32
  }
  func.func @transform_5(%arg0: i32) -> (i32, i32) {
    %c0_i32 = arith.constant 0 : i32
    %c0_i32_0 = arith.constant 0 : i32
    %c0_i32_1 = arith.constant 0 : i32
    return %c0_i32, %c0_i32_0 : i32, i32
  }
  func.func @transform_6(%arg0: i32) -> (i32, i32) {
    %c0_i32 = arith.constant 0 : i32
    %c0_i32_0 = arith.constant 0 : i32
    return %arg0, %c0_i32 : i32, i32
  }
}

module attributes {stable_mosaic.version = 11 : i64} {
  func.func @_adapter_kernel(%arg0: i32, %arg1: memref<16x128xf32, #tpu.memory_space<vmem>>, %arg2: memref<128x128xbf16, #tpu.memory_space<vmem>>, %arg3: memref<1x128xf32, #tpu.memory_space<vmem>>, %arg4: memref<128x128xbf16, #tpu.memory_space<vmem>>, %arg5: memref<1x128xf32, #tpu.memory_space<vmem>>, %arg6: memref<1x128xf32, #tpu.memory_space<vmem>>, %arg7: memref<16x128xf32, #tpu.memory_space<vmem>>) attributes {dimension_semantics = [#tpu.dimension_semantics<parallel>], iteration_bounds = array<i64: 1>, scalar_prefetch = 0 : i64, scratch_operands = 0 : i64, tpu.core_type = #tpu.core_type<tc>, window_params = [{transform_indices = @transform_0, window_bounds = array<i64: 16, 128>}, {pipeline_mode = #tpu.pipeline_mode<synchronous>, transform_indices = @transform_1, window_bounds = array<i64: 128, 128>}, {pipeline_mode = #tpu.pipeline_mode<synchronous>, transform_indices = @transform_2, window_bounds = array<i64: 1, 128>}, {pipeline_mode = #tpu.pipeline_mode<synchronous>, transform_indices = @transform_3, window_bounds = array<i64: 128, 128>}, {pipeline_mode = #tpu.pipeline_mode<synchronous>, transform_indices = @transform_4, window_bounds = array<i64: 1, 128>}, {pipeline_mode = #tpu.pipeline_mode<synchronous>, transform_indices = @transform_5, window_bounds = array<i64: 1, 128>}, {transform_indices = @transform_6, window_bounds = array<i64: 16, 128>}]} {
    %c0 = arith.constant 0 : index
    %c0_0 = arith.constant 0 : index
    %0 = vector.load %arg1[%c0, %c0_0] : memref<16x128xf32, #tpu.memory_space<vmem>>, vector<16x128xf32>
    %cst = arith.constant dense<0.000000e+00> : vector<16xf32>
    %1 = vector.multi_reduction <add>, %0, %cst [1] : vector<16x128xf32> to vector<16xf32>
    %2 = vector.shape_cast %1 : vector<16xf32> to vector<16x1xf32>
    %cst_1 = arith.constant 3.125000e-02 : f32
    %3 = vector.broadcast %cst_1 : f32 to vector<16x1xf32>
    %4 = arith.mulf %2, %3 : vector<16x1xf32>
    %5 = vector.broadcast %4 : vector<16x1xf32> to vector<16x128xf32>
    %6 = arith.subf %0, %5 : vector<16x128xf32>
    %7 = arith.mulf %6, %6 : vector<16x128xf32>
    %cst_2 = arith.constant dense<0.000000e+00> : vector<16xf32>
    %8 = vector.multi_reduction <add>, %7, %cst_2 [1] : vector<16x128xf32> to vector<16xf32>
    %9 = vector.shape_cast %8 : vector<16xf32> to vector<16x1xf32>
    %10 = arith.mulf %4, %4 : vector<16x1xf32>
    %cst_3 = arith.constant 9.600000e+01 : f32
    %11 = vector.broadcast %cst_3 : f32 to vector<16x1xf32>
    %12 = arith.mulf %11, %10 : vector<16x1xf32>
    %13 = arith.subf %9, %12 : vector<16x1xf32>
    %cst_4 = arith.constant 3.125000e-02 : f32
    %14 = vector.broadcast %cst_4 : f32 to vector<16x1xf32>
    %15 = arith.mulf %13, %14 : vector<16x1xf32>
    %cst_5 = arith.constant 9.99999974E-6 : f32
    %16 = vector.broadcast %cst_5 : f32 to vector<16x1xf32>
    %17 = arith.addf %15, %16 : vector<16x1xf32>
    %18 = math.rsqrt %17 : vector<16x1xf32>
    %19 = vector.broadcast %18 : vector<16x1xf32> to vector<16x128xf32>
    %20 = arith.mulf %6, %19 : vector<16x128xf32>
    %21 = arith.truncf %20 : vector<16x128xf32> to vector<16x128xbf16>
    %c0_6 = arith.constant 0 : index
    %c0_7 = arith.constant 0 : index
    %22 = vector.load %arg2[%c0_6, %c0_7] : memref<128x128xbf16, #tpu.memory_space<vmem>>, vector<128x128xbf16>
    %cst_8 = arith.constant dense<0.000000e+00> : vector<16x128xf32>
    %23 = tpu.matmul %21, %22, %cst_8 {dimension_numbers = #tpu.dot_dimension_numbers<[1], [0], [0], [1], [0, 0, 1, 1], [], []>} : vector<16x128xbf16>, vector<128x128xbf16>, vector<16x128xf32> -> vector<16x128xf32>
    %c0_9 = arith.constant 0 : index
    %c0_10 = arith.constant 0 : index
    %24 = vector.load %arg3[%c0_9, %c0_10] : memref<1x128xf32, #tpu.memory_space<vmem>>, vector<1x128xf32>
    %25 = vector.broadcast %24 : vector<1x128xf32> to vector<16x128xf32>
    %26 = arith.addf %23, %25 : vector<16x128xf32>
    %cst_11 = arith.constant 5.000000e-01 : f32
    %27 = vector.broadcast %cst_11 : f32 to vector<16x128xf32>
    %28 = arith.mulf %27, %26 : vector<16x128xf32>
    %29 = arith.mulf %26, %26 : vector<16x128xf32>
    %30 = arith.mulf %29, %26 : vector<16x128xf32>
    %cst_12 = arith.constant 4.471500e-02 : f32
    %31 = vector.broadcast %cst_12 : f32 to vector<16x128xf32>
    %32 = arith.mulf %31, %30 : vector<16x128xf32>
    %33 = arith.addf %26, %32 : vector<16x128xf32>
    %cst_13 = arith.constant 0.797884583 : f32
    %34 = vector.broadcast %cst_13 : f32 to vector<16x128xf32>
    %35 = arith.mulf %34, %33 : vector<16x128xf32>
    %36 = math.tanh %35 : vector<16x128xf32>
    %cst_14 = arith.constant 1.000000e+00 : f32
    %37 = vector.broadcast %cst_14 : f32 to vector<16x128xf32>
    %38 = arith.addf %37, %36 : vector<16x128xf32>
    %39 = arith.mulf %28, %38 : vector<16x128xf32>
    %40 = arith.truncf %39 : vector<16x128xf32> to vector<16x128xbf16>
    %c0_15 = arith.constant 0 : index
    %c0_16 = arith.constant 0 : index
    %41 = vector.load %arg4[%c0_15, %c0_16] : memref<128x128xbf16, #tpu.memory_space<vmem>>, vector<128x128xbf16>
    %cst_17 = arith.constant dense<0.000000e+00> : vector<16x128xf32>
    %42 = tpu.matmul %40, %41, %cst_17 {dimension_numbers = #tpu.dot_dimension_numbers<[1], [0], [0], [1], [0, 0, 1, 1], [], []>} : vector<16x128xbf16>, vector<128x128xbf16>, vector<16x128xf32> -> vector<16x128xf32>
    %43 = arith.addf %0, %42 : vector<16x128xf32>
    %cst_18 = arith.constant dense<0.000000e+00> : vector<16xf32>
    %44 = vector.multi_reduction <add>, %43, %cst_18 [1] : vector<16x128xf32> to vector<16xf32>
    %45 = vector.shape_cast %44 : vector<16xf32> to vector<16x1xf32>
    %cst_19 = arith.constant 3.125000e-02 : f32
    %46 = vector.broadcast %cst_19 : f32 to vector<16x1xf32>
    %47 = arith.mulf %45, %46 : vector<16x1xf32>
    %48 = vector.broadcast %47 : vector<16x1xf32> to vector<16x128xf32>
    %49 = arith.subf %43, %48 : vector<16x128xf32>
    %50 = arith.mulf %49, %49 : vector<16x128xf32>
    %cst_20 = arith.constant dense<0.000000e+00> : vector<16xf32>
    %51 = vector.multi_reduction <add>, %50, %cst_20 [1] : vector<16x128xf32> to vector<16xf32>
    %52 = vector.shape_cast %51 : vector<16xf32> to vector<16x1xf32>
    %53 = arith.mulf %47, %47 : vector<16x1xf32>
    %cst_21 = arith.constant 9.600000e+01 : f32
    %54 = vector.broadcast %cst_21 : f32 to vector<16x1xf32>
    %55 = arith.mulf %54, %53 : vector<16x1xf32>
    %56 = arith.subf %52, %55 : vector<16x1xf32>
    %cst_22 = arith.constant 3.125000e-02 : f32
    %57 = vector.broadcast %cst_22 : f32 to vector<16x1xf32>
    %58 = arith.mulf %56, %57 : vector<16x1xf32>
    %cst_23 = arith.constant 9.99999974E-6 : f32
    %59 = vector.broadcast %cst_23 : f32 to vector<16x1xf32>
    %60 = arith.addf %58, %59 : vector<16x1xf32>
    %61 = math.rsqrt %60 : vector<16x1xf32>
    %62 = vector.broadcast %61 : vector<16x1xf32> to vector<16x128xf32>
    %63 = arith.mulf %49, %62 : vector<16x128xf32>
    %c0_24 = arith.constant 0 : index
    %c0_25 = arith.constant 0 : index
    %64 = vector.load %arg5[%c0_24, %c0_25] : memref<1x128xf32, #tpu.memory_space<vmem>>, vector<1x128xf32>
    %65 = vector.broadcast %64 : vector<1x128xf32> to vector<16x128xf32>
    %66 = arith.mulf %63, %65 : vector<16x128xf32>
    %c0_26 = arith.constant 0 : index
    %c0_27 = arith.constant 0 : index
    %67 = vector.load %arg6[%c0_26, %c0_27] : memref<1x128xf32, #tpu.memory_space<vmem>>, vector<1x128xf32>
    %68 = vector.broadcast %67 : vector<1x128xf32> to vector<16x128xf32>
    %69 = arith.addf %66, %68 : vector<16x128xf32>
    %c0_28 = arith.constant 0 : index
    %c0_29 = arith.constant 0 : index
    %70 = vector.load %arg7[%c0_28, %c0_29] : memref<16x128xf32, #tpu.memory_space<vmem>>, vector<16x128xf32>
    tpu.vector_store %arg7[%c0_28, %c0_29], %69 {strides = array<i32>} : memref<16x128xf32, #tpu.memory_space<vmem>>, vector<16x128xf32>,
    return
  }
  func.func @transform_0(%arg0: i32) -> (i32, i32) {
    %c0_i32 = arith.constant 0 : i32
    %c0_i32_0 = arith.constant 0 : i32
    return %arg0, %c0_i32 : i32, i32
  }
  func.func @transform_1(%arg0: i32) -> (i32, i32) {
    %c0_i32 = arith.constant 0 : i32
    %c0_i32_0 = arith.constant 0 : i32
    %c0_i32_1 = arith.constant 0 : i32
    return %c0_i32, %c0_i32_0 : i32, i32
  }
  func.func @transform_2(%arg0: i32) -> (i32, i32) {
    %c0_i32 = arith.constant 0 : i32
    %c0_i32_0 = arith.constant 0 : i32
    %c0_i32_1 = arith.constant 0 : i32
    return %c0_i32, %c0_i32_0 : i32, i32
  }
  func.func @transform_3(%arg0: i32) -> (i32, i32) {
    %c0_i32 = arith.constant 0 : i32
    %c0_i32_0 = arith.constant 0 : i32
    %c0_i32_1 = arith.constant 0 : i32
    return %c0_i32, %c0_i32_0 : i32, i32
  }
  func.func @transform_4(%arg0: i32) -> (i32, i32) {
    %c0_i32 = arith.constant 0 : i32
    %c0_i32_0 = arith.constant 0 : i32
    %c0_i32_1 = arith.constant 0 : i32
    return %c0_i32, %c0_i32_0 : i32, i32
  }
  func.func @transform_5(%arg0: i32) -> (i32, i32) {
    %c0_i32 = arith.constant 0 : i32
    %c0_i32_0 = arith.constant 0 : i32
    %c0_i32_1 = arith.constant 0 : i32
    return %c0_i32, %c0_i32_0 : i32, i32
  }
  func.func @transform_6(%arg0: i32) -> (i32, i32) {
    %c0_i32 = arith.constant 0 : i32
    %c0_i32_0 = arith.constant 0 : i32
    return %arg0, %c0_i32 : i32, i32
  }
}

</mosaic_0001>

<bundles_post_ra>
// kernel: tpu_custom_call.1
= control target key start
LH: loop header
LB: loop body
LE: loop exit
PB: predicated region body
PF: predicated region fallthrough
CT: control target
= control target key end

     0   :  { %11 = vsyncpa [#allocation3], 0  ;;  %s666_s0 = inlined_call_operand.hbm [shape: f32[16,128], index: 0, kind: input, shape index: {}]   ;;  %s667_s1 = inlined_call_operand.hbm [shape: bf16[128,128], index: 1, kind: input, shape index: {}]   ;;  %s668_s2 = inlined_call_operand.vmem [shape: f32[1,128], index: 2, kind: input, shape index: {}]   ;;  %s669_s3 = inlined_call_operand.hbm [shape: bf16[128,128], index: 3, kind: input, shape index: {}]   ;;  %s670_s4 = inlined_call_operand.vmem [shape: f32[1,128], index: 4, kind: input, shape index: {}]   ;;  %s671_s5 = inlined_call_operand.vmem [shape: f32[1,128], index: 5, kind: input, shape index: {}]   ;;  %s672_s6 = inlined_call_operand.hbm [shape: f32[16,128], index: 6, kind: output, shape index: {}]  }
   0x1   :  { %12 = vsyncpa [#allocation6], 0  ;;  %s31_s23 = sshll.u32 %s667_s1, 4  ;;  %s32_s23 = int_to_ptr.hbm [resolvable:$true] %s31_s23 }
   0x2   :  { %13 = vsyncpa [#allocation4], 0  ;;  %s586_s24 = smov [#allocation5]   ;;  %s18_s28 = sshll.u32 %s666_s0, 4  ;;  %s19_s28 = int_to_ptr.hbm [resolvable:$true] %s18_s28 }
   0x3   :  { %s33_s25 = sshll.u32 %s586_s24, 4  ;;  %s587_s29 = smov 64   ;;  %s34_s25 = int_to_ptr.vmem [resolvable:$true] %s33_s25 }
   0x4   :  { %s588_s30 = smov 4   ;;  %s589_s7 = smov [#allocation2]  }
   0x5   :  { %39 = dma.hbm_to_vmem [thread:$0]  %s32_s23, 1024, %s34_s25, [#allocation6], %s587_s29, %s587_s29, %s588_s30  }
   0x6   :  { %s20_s8 = sshll.u32 %s589_s7, 4  ;;  %s590_s9 = smov 128   ;;  %s21_s8 = int_to_ptr.vmem [resolvable:$true] %s20_s8 }
   0x7   :  { %s591_s10 = smov 8   ;;  %s46_s12 = sshll.u32 %s669_s3, 4  ;;  %s47_s12 = int_to_ptr.hbm [resolvable:$true] %s46_s12 }
   0x8   :  { %26 = dma.hbm_to_vmem [thread:$0]  %s19_s28, 256, %s21_s8, [#allocation3], %s590_s9, %s590_s9, %s591_s10  }
   0x9   :  { %s592_s13 = smov [#allocation7]  }
   0xa   :  { %s48_s0 = sshll.u32 %s592_s13, 4  ;;  %s49_s0 = int_to_ptr.vmem [resolvable:$true] %s48_s0 }
   0xb   :  { %54 = dma.hbm_to_vmem [thread:$0]  %s47_s12, 1024, %s49_s0, [#allocation6], %s587_s29, %s587_s29, %s588_s30  }
   0xc   :  { %580 = dma.done.wait [#allocation3], 256  }
   0xd   :  { %581 = vsyncadd [#allocation3], 4294967040 }
   0xe   :  { %582 = dma.done.wait [#allocation6], 2048  }
   0xf   :  { %583 = vsyncadd [#allocation6], 4294965248  ;;  %v641_v0 = vld [vmem:[#allocation2] sm:$0xff]  ;;  %v644_v1 = vld [vmem:[#allocation2 + $0x8] sm:$0xff]  ;;  %s593_s18 = smov [#allocation8]   ;;  %s367_s21 = sshll.u32 %s672_s6, 4  ;;  %s368_s21 = int_to_ptr.hbm [resolvable:$true] %s367_s21 }
  0x10   :  { %73 = vadd.xlane.f32.xlu0 %v641_v0  ;;  %v452_v10 = vld [vmem:[#allocation5 + $0x38] sm:$0xff]  ;;  %v451_v11 = vld [vmem:[#allocation5 + $0x30] sm:$0xff]  ;;  %v450_v12 = vld [vmem:[#allocation5 + $0x28] sm:$0xff] }
  0x11   :  { %188 = vmatpush.bf16.msra.mxu0 %v452_v10  ;;  %v449_v13 = vld [vmem:[#allocation5 + $0x20] sm:$0xff]  ;;  %v448_v14 = vld [vmem:[#allocation5 + $0x18] sm:$0xff]  ;;  %v447_v15 = vld [vmem:[#allocation5 + $0x10] sm:$0xff] }
  0x12   :  { %v446_v17 = vld [vmem:[#allocation5 + $0x8] sm:$0xff]  ;;  %v445_v18 = vld [vmem:[#allocation5] sm:$0xff]  ;;  %v460_v47 = vld [vmem:[#allocation7 + $0x38] sm:$0xff] }
  0x13   :  { %285 = vmatpush.bf16.msra.mxu1 %v460_v47  ;;  %v459_v48 = vld [vmem:[#allocation7 + $0x30] sm:$0xff]  ;;  %v458_v49 = vld [vmem:[#allocation7 + $0x28] sm:$0xff]  ;;  %v457_v50 = vld [vmem:[#allocation7 + $0x20] sm:$0xff] }
  0x14   :  { %v456_v51 = vld [vmem:[#allocation7 + $0x18] sm:$0xff]  ;;  %v455_v52 = vld [vmem:[#allocation7 + $0x10] sm:$0xff]  ;;  %v454_v53 = vld [vmem:[#allocation7 + $0x8] sm:$0xff] }
  0x15   :  { %189 = vmatpush.bf16.msra.mxu0 %v451_v11  ;;  %v453_v54 = vld [vmem:[#allocation7] sm:$0xff]  ;;  %v469_v55 = vld [vmem:[%s668_s2] ss:$0 sm:$0xff] }
  0x16   :  { %v470_v47 = vld [vmem:[%s670_s4] ss:$0 sm:$0xff]  ;;  %s365_s4 = sshll.u32 %s593_s18, 4  ;;  %s366_s4 = int_to_ptr.vmem [resolvable:$true] %s365_s4 }
  0x17   :  { %286 = vmatpush.bf16.msra.mxu1 %v459_v48 }
  0x18   :  { %75 = vadd.xlane.f32.xlu0 %v644_v1 }
  0x19   :  { %190 = vmatpush.bf16.msra.mxu0 %v450_v12 }
  0x1b   :  { %287 = vmatpush.bf16.msra.mxu1 %v458_v49 }
  0x1d   :  { %191 = vmatpush.bf16.msra.mxu0 %v449_v13 }
  0x1f   :  { %288 = vmatpush.bf16.msra.mxu1 %v457_v50 }
  0x21   :  { %192 = vmatpush.bf16.msra.mxu0 %v448_v14 }
  0x23   :  { %289 = vmatpush.bf16.msra.mxu1 %v456_v51  ;;  %v471_v51 = vld [vmem:[%s671_s5] ss:$0 sm:$0xff] }
  0x25   :  { %193 = vmatpush.bf16.msra.mxu0 %v447_v15 }
  0x27   :  { %290 = vmatpush.bf16.msra.mxu1 %v455_v52 }
  0x29   :  { %194 = vmatpush.bf16.msra.mxu0 %v446_v17 }
  0x2b   :  { %291 = vmatpush.bf16.msra.mxu1 %v454_v53 }
  0x2d   :  { %195 = vmatpush.bf16.msra.mxu0 %v445_v18 }
  0x2f   :  { %292 = vmatpush.bf16.msra.mxu1 %v453_v54 }
  0x83   :  { %v74_v2 = vpop.xlane.xlu0 %73 }
  0x84   :  { %v77_v3 = vmul.f32 0.03125, %v74_v2 }
  0x86   :  { %v79_v4 = vsub.f32 %v641_v0, %v77_v3  ;;  %v87_v16 = vmul.f32 %v77_v3, %v77_v3 }
  0x88   :  { %v81_v5 = vmul.f32 %v79_v4, %v79_v4  ;;  %v89_v19 = vmul.f32 96.0, %v87_v16 }
  0x8a   :  { %83 = vadd.xlane.f32.xlu1 %v81_v5 }
  0x8b   :  { %v76_v6 = vpop.xlane.xlu0 %75 }
  0x8c   :  { %v78_v7 = vmul.f32 0.03125, %v76_v6 }
  0x8e   :  { %v80_v8 = vsub.f32 %v644_v1, %v78_v7  ;;  %v88_v22 = vmul.f32 %v78_v7, %v78_v7 }
  0x90   :  { %v82_v9 = vmul.f32 %v80_v8, %v80_v8  ;;  %v90_v25 = vmul.f32 96.0, %v88_v22 }
  0x92   :  { %85 = vadd.xlane.f32.xlu1 %v82_v9 }
  0xfd   :  { %v84_v20 = vpop.xlane.xlu1 %83 }
  0xfe   :  { %v91_v21 = vsub.f32 %v84_v20, %v89_v19 }
 0x100   :  { %v93_v23 = vmul.f32 0.03125, %v91_v21 }
 0x102   :  { %v95_v24 = vadd.f32 1e-05, %v93_v23 }
 0x104   :  { %472 = vrsqrt.f32 %v95_v24  ;;  %vm103_vm1 = vweird.f32 %v95_v24 }
 0x105   :  { %v86_v26 = vpop.xlane.xlu1 %85 }
 0x106   :  { %v92_v27 = vsub.f32 %v86_v26, %v90_v25 }
 0x108   :  { %v94_v28 = vmul.f32 0.03125, %v92_v27 }
 0x10a   :  { %v473_v29 = vpop.eup %472  ;;  %v96_v30 = vadd.f32 1e-05, %v94_v28 }
 0x10b   :  { %v98_v31 = vmul.f32 %v473_v29, %v95_v24  ;;  %vm104_vm0 = vweird.f32 %v473_v29 }
 0x10c   :  { %474 = vrsqrt.f32 %v96_v30  ;;  %vm105_vm3 = vmor %vm103_vm1, %vm104_vm0  ;;  %vm113_vm4 = vweird.f32 %v96_v30 }
 0x10d   :  { %v99_v32 = vmul.f32 %v473_v29, %v98_v31 }
 0x10f   :  { %v100_v33 = vmul.f32 0.5, %v99_v32 }
 0x111   :  { %v101_v35 = vsub.f32 1.5, %v100_v33 }
 0x112   :  { %v475_v34 = vpop.eup %474 }
 0x113   :  { %v108_v36 = vmul.f32 %v475_v34, %v96_v30  ;;  %v102_v39 = vmul.f32 %v473_v29, %v101_v35  ;;  %vm114_vm2 = vweird.f32 %v475_v34 }
 0x114   :  { %vm115_vm5 = vmor %vm113_vm4, %vm114_vm2 }
 0x115   :  { %v109_v37 = vmul.f32 %v475_v34, %v108_v36  ;;  %v106_v41 = vsel %vm105_vm3, %v473_v29, %v102_v39 }
 0x116   :  { %v117_v44 = vmul.f32 %v106_v41, %v79_v4 }
 0x117   :  { %v110_v38 = vmul.f32 0.5, %v109_v37 }
 0x119   :  { %v111_v40 = vsub.f32 1.5, %v110_v38 }
 0x11b   :  { %v112_v42 = vmul.f32 %v475_v34, %v111_v40 }
 0x11d   :  { %v116_v43 = vsel %vm115_vm5, %v475_v34, %v112_v42 }
 0x11e   :  { %v118_v45 = vmul.f32 %v116_v43, %v80_v8 }
 0x120   :  { %v119_v46 = vpack.c.bf16 %v118_v45, %v117_v44 }
 0x122   :  { %196 = vmatmul.bf16.vlgmr.msra.gmra.mxu0 %v119_v46 }
 0x19f   :  { %v197_v56 = vpop.f32.mrf.mxu0 }
 0x1a0   :  { %v198_v57 = vadd.f32 %v469_v55, %v197_v56 }
 0x1a2   :  { %v204_v58 = vmul.f32 %v198_v57, %v198_v57  ;;  %v202_v11 = vmul.f32 0.5, %v198_v57 }
 0x1a4   :  { %v206_v59 = vmul.f32 %v204_v58, %v198_v57 }
 0x1a6   :  { %v208_v60 = vmul.f32 0.044715, %v206_v59 }
 0x1a7   :  { %v199_v61 = vpop.f32.mrf.mxu0 }
 0x1a8   :  { %v200_v62 = vadd.f32 %v469_v55, %v199_v61  ;;  %v210_v63 = vadd.f32 %v208_v60, %v198_v57 }
 0x1aa   :  { %v205_v2 = vmul.f32 %v200_v62, %v200_v62  ;;  %v212_v4 = vmul.f32 0.7978846, %v210_v63  ;;  %v203_v12 = vmul.f32 0.5, %v200_v62 }
 0x1ac   :  { %v207_v3 = vmul.f32 %v205_v2, %v200_v62  ;;  %476 = vtanh.f32 %v212_v4 }
 0x1ae   :  { %v209_v5 = vmul.f32 0.044715, %v207_v3 }
 0x1b0   :  { %v211_v6 = vadd.f32 %v209_v5, %v200_v62 }
 0x1b2   :  { %v213_v7 = vmul.f32 0.7978846, %v211_v6  ;;  %v477_v8 = vpop.eup %476 }
 0x1b3   :  { %v216_v9 = vadd.f32 1.0, %v477_v8 }
 0x1b4   :  { %478 = vtanh.f32 %v213_v7 }
 0x1b5   :  { %v218_v14 = vmul.f32 %v216_v9, %v202_v11 }
 0x1ba   :  { %v479_v10 = vpop.eup %478 }
 0x1bb   :  { %v217_v13 = vadd.f32 1.0, %v479_v10 }
 0x1bd   :  { %v219_v15 = vmul.f32 %v217_v13, %v203_v12 }
 0x1bf   :  { %v220_v16 = vpack.c.bf16 %v219_v15, %v218_v14 }
 0x1c1   :  { %293 = vmatmul.bf16.vlgmr.msra.gmra.mxu1 %v220_v16 }
 0x23e   :  { %v294_v17 = vpop.f32.mrf.mxu1 }
 0x23f   :  { %v299_v18 = vadd.f32 %v294_v17, %v641_v0 }
 0x241   :  { %301 = vadd.xlane.f32.xlu2 %v299_v18 }
 0x246   :  { %v296_v19 = vpop.f32.mrf.mxu1 }
 0x247   :  { %v300_v20 = vadd.f32 %v296_v19, %v644_v1 }
 0x249   :  { %303 = vadd.xlane.f32.xlu2 %v300_v20 }
 0x2b4   :  { %v302_v21 = vpop.xlane.xlu2 %301 }
 0x2b5   :  { %v305_v22 = vmul.f32 0.03125, %v302_v21 }
 0x2b7   :  { %v307_v23 = vsub.f32 %v299_v18, %v305_v22  ;;  %v315_v29 = vmul.f32 %v305_v22, %v305_v22 }
 0x2b9   :  { %v309_v24 = vmul.f32 %v307_v23, %v307_v23  ;;  %v317_v30 = vmul.f32 96.0, %v315_v29 }
 0x2bb   :  { %311 = vadd.xlane.f32.xlu0 %v309_v24 }
 0x2bc   :  { %v304_v25 = vpop.xlane.xlu2 %303 }
 0x2bd   :  { %v306_v26 = vmul.f32 0.03125, %v304_v25 }
 0x2bf   :  { %v308_v27 = vsub.f32 %v300_v20, %v306_v26  ;;  %v316_v0 = vmul.f32 %v306_v26, %v306_v26 }
 0x2c1   :  { %v310_v28 = vmul.f32 %v308_v27, %v308_v27  ;;  %v318_v35 = vmul.f32 96.0, %v316_v0 }
 0x2c3   :  { %313 = vadd.xlane.f32.xlu1 %v310_v28 }
 0x32e   :  { %v312_v31 = vpop.xlane.xlu0 %311 }
 0x32f   :  { %v319_v32 = vsub.f32 %v312_v31, %v317_v30 }
 0x331   :  { %v321_v33 = vmul.f32 0.03125, %v319_v32 }
 0x333   :  { %v323_v34 = vadd.f32 1e-05, %v321_v33 }
 0x335   :  { %480 = vrsqrt.f32 %v323_v34  ;;  %vm331_vm7 = vweird.f32 %v323_v34 }
 0x336   :  { %v314_v1 = vpop.xlane.xlu1 %313 }
 0x337   :  { %v320_v36 = vsub.f32 %v314_v1, %v318_v35 }
 0x339   :  { %v322_v37 = vmul.f32 0.03125, %v320_v36 }
 0x33b   :  { %v481_v38 = vpop.eup %480  ;;  %v324_v39 = vadd.f32 1e-05, %v322_v37 }
 0x33c   :  { %v326_v40 = vmul.f32 %v481_v38, %v323_v34  ;;  %vm332_vm6 = vweird.f32 %v481_v38 }
 0x33d   :  { %482 = vrsqrt.f32 %v324_v39  ;;  %vm333_vm8 = vmor %vm331_vm7, %vm332_vm6  ;;  %vm341_vm10 = vweird.f32 %v324_v39 }
 0x33e   :  { %v327_v41 = vmul.f32 %v481_v38, %v326_v40 }
 0x340   :  { %v328_v42 = vmul.f32 0.5, %v327_v41 }
 0x342   :  { %v329_v43 = vsub.f32 1.5, %v328_v42 }
 0x343   :  { %v483_v44 = vpop.eup %482 }
 0x344   :  { %v330_v45 = vmul.f32 %v481_v38, %v329_v43  ;;  %v336_v46 = vmul.f32 %v483_v44, %v324_v39  ;;  %vm342_vm9 = vweird.f32 %v483_v44 }
 0x345   :  { %vm343_vm11 = vmor %vm341_vm10, %vm342_vm9 }
 0x346   :  { %v334_v48 = vsel %vm333_vm8, %v481_v38, %v330_v45  ;;  %v337_v49 = vmul.f32 %v483_v44, %v336_v46 }
 0x347   :  { %v345_v50 = vmul.f32 %v334_v48, %v307_v23 }
 0x348   :  { %v338_v52 = vmul.f32 0.5, %v337_v49 }
 0x349   :  { %v351_v53 = vmul.f32 %v470_v47, %v345_v50 }
 0x34a   :  { %v339_v54 = vsub.f32 1.5, %v338_v52 }
 0x34b   :  { %v357_v55 = vadd.f32 %v471_v51, %v351_v53 }
 0x34c   :  { %v340_v56 = vmul.f32 %v483_v44, %v339_v54 }
 0x34d   :  { %359 = vst [vmem:[#allocation8] sm:$0xff] %v357_v55 }
 0x34e   :  { %v344_v57 = vsel %vm343_vm11, %v483_v44, %v340_v56 }
 0x34f   :  { %v346_v58 = vmul.f32 %v344_v57, %v308_v27 }
 0x351   :  { %v352_v59 = vmul.f32 %v470_v47, %v346_v58 }
 0x353   :  { %v358_v60 = vadd.f32 %v471_v51, %v352_v59 }
 0x355   :  { %360 = vst [vmem:[#allocation8 + $0x8] sm:$0xff] %v358_v60 }
 0x356   :  { %373 = dma.vmem_to_hbm [thread:$0]  %s366_s4, 256, %s368_s21, [#allocation4], %s590_s9, %s590_s9, %s591_s10  }
 0x357   :  { %584 = dma.done.wait [#allocation4], 256  }
 0x358   :  { %585 = vsyncadd [#allocation4], 4294967040 }
 0x359   :  { %378 = vsyncpa [#allocation3], 1 }
 0x35a   :  { %379 = vsyncpa [#allocation6], 1 }
 0x35b   :  { %380 = vsyncpa [#allocation4], 1 }

// kernel: tpu_custom_call.1
= control target key start
LH: loop header
LB: loop body
LE: loop exit
PB: predicated region body
PF: predicated region fallthrough
CT: control target
= control target key end

     0   :  { %11 = vsyncpa [#allocation3], 0  ;;  %s666_s0 = inlined_call_operand.hbm [shape: f32[16,128], index: 0, kind: input, shape index: {}]   ;;  %s667_s1 = inlined_call_operand.hbm [shape: bf16[128,128], index: 1, kind: input, shape index: {}]   ;;  %s668_s2 = inlined_call_operand.vmem [shape: f32[1,128], index: 2, kind: input, shape index: {}]   ;;  %s669_s3 = inlined_call_operand.hbm [shape: bf16[128,128], index: 3, kind: input, shape index: {}]   ;;  %s670_s4 = inlined_call_operand.vmem [shape: f32[1,128], index: 4, kind: input, shape index: {}]   ;;  %s671_s5 = inlined_call_operand.vmem [shape: f32[1,128], index: 5, kind: input, shape index: {}]   ;;  %s672_s6 = inlined_call_operand.hbm [shape: f32[16,128], index: 6, kind: output, shape index: {}]  }
   0x1   :  { %12 = vsyncpa [#allocation6], 0  ;;  %s31_s23 = sshll.u32 %s667_s1, 4  ;;  %s32_s23 = int_to_ptr.hbm [resolvable:$true] %s31_s23 }
   0x2   :  { %13 = vsyncpa [#allocation4], 0  ;;  %s586_s24 = smov [#allocation5]   ;;  %s18_s28 = sshll.u32 %s666_s0, 4  ;;  %s19_s28 = int_to_ptr.hbm [resolvable:$true] %s18_s28 }
   0x3   :  { %s33_s25 = sshll.u32 %s586_s24, 4  ;;  %s587_s29 = smov 64   ;;  %s34_s25 = int_to_ptr.vmem [resolvable:$true] %s33_s25 }
   0x4   :  { %s588_s30 = smov 4   ;;  %s589_s7 = smov [#allocation2]  }
   0x5   :  { %39 = dma.hbm_to_vmem [thread:$0]  %s32_s23, 1024, %s34_s25, [#allocation6], %s587_s29, %s587_s29, %s588_s30  }
   0x6   :  { %s20_s8 = sshll.u32 %s589_s7, 4  ;;  %s590_s9 = smov 128   ;;  %s21_s8 = int_to_ptr.vmem [resolvable:$true] %s20_s8 }
   0x7   :  { %s591_s10 = smov 8   ;;  %s46_s12 = sshll.u32 %s669_s3, 4  ;;  %s47_s12 = int_to_ptr.hbm [resolvable:$true] %s46_s12 }
   0x8   :  { %26 = dma.hbm_to_vmem [thread:$0]  %s19_s28, 256, %s21_s8, [#allocation3], %s590_s9, %s590_s9, %s591_s10  }
   0x9   :  { %s592_s13 = smov [#allocation7]  }
   0xa   :  { %s48_s0 = sshll.u32 %s592_s13, 4  ;;  %s49_s0 = int_to_ptr.vmem [resolvable:$true] %s48_s0 }
   0xb   :  { %54 = dma.hbm_to_vmem [thread:$0]  %s47_s12, 1024, %s49_s0, [#allocation6], %s587_s29, %s587_s29, %s588_s30  }
   0xc   :  { %580 = dma.done.wait [#allocation3], 256  }
   0xd   :  { %581 = vsyncadd [#allocation3], 4294967040 }
   0xe   :  { %582 = dma.done.wait [#allocation6], 2048  }
   0xf   :  { %583 = vsyncadd [#allocation6], 4294965248  ;;  %v641_v0 = vld [vmem:[#allocation2] sm:$0xff]  ;;  %v644_v1 = vld [vmem:[#allocation2 + $0x8] sm:$0xff]  ;;  %s593_s18 = smov [#allocation8]   ;;  %s367_s21 = sshll.u32 %s672_s6, 4  ;;  %s368_s21 = int_to_ptr.hbm [resolvable:$true] %s367_s21 }
  0x10   :  { %73 = vadd.xlane.f32.xlu0 %v641_v0  ;;  %v452_v10 = vld [vmem:[#allocation5 + $0x38] sm:$0xff]  ;;  %v451_v11 = vld [vmem:[#allocation5 + $0x30] sm:$0xff]  ;;  %v450_v12 = vld [vmem:[#allocation5 + $0x28] sm:$0xff] }
  0x11   :  { %188 = vmatpush.bf16.msra.mxu0 %v452_v10  ;;  %v449_v13 = vld [vmem:[#allocation5 + $0x20] sm:$0xff]  ;;  %v448_v14 = vld [vmem:[#allocation5 + $0x18] sm:$0xff]  ;;  %v447_v15 = vld [vmem:[#allocation5 + $0x10] sm:$0xff] }
  0x12   :  { %v446_v17 = vld [vmem:[#allocation5 + $0x8] sm:$0xff]  ;;  %v445_v18 = vld [vmem:[#allocation5] sm:$0xff]  ;;  %v460_v47 = vld [vmem:[#allocation7 + $0x38] sm:$0xff] }
  0x13   :  { %285 = vmatpush.bf16.msra.mxu1 %v460_v47  ;;  %v459_v48 = vld [vmem:[#allocation7 + $0x30] sm:$0xff]  ;;  %v458_v49 = vld [vmem:[#allocation7 + $0x28] sm:$0xff]  ;;  %v457_v50 = vld [vmem:[#allocation7 + $0x20] sm:$0xff] }
  0x14   :  { %v456_v51 = vld [vmem:[#allocation7 + $0x18] sm:$0xff]  ;;  %v455_v52 = vld [vmem:[#allocation7 + $0x10] sm:$0xff]  ;;  %v454_v53 = vld [vmem:[#allocation7 + $0x8] sm:$0xff] }
  0x15   :  { %189 = vmatpush.bf16.msra.mxu0 %v451_v11  ;;  %v453_v54 = vld [vmem:[#allocation7] sm:$0xff]  ;;  %v469_v55 = vld [vmem:[%s668_s2] ss:$0 sm:$0xff] }
  0x16   :  { %v470_v47 = vld [vmem:[%s670_s4] ss:$0 sm:$0xff]  ;;  %s365_s4 = sshll.u32 %s593_s18, 4  ;;  %s366_s4 = int_to_ptr.vmem [resolvable:$true] %s365_s4 }
  0x17   :  { %286 = vmatpush.bf16.msra.mxu1 %v459_v48 }
  0x18   :  { %75 = vadd.xlane.f32.xlu0 %v644_v1 }
  0x19   :  { %190 = vmatpush.bf16.msra.mxu0 %v450_v12 }
  0x1b   :  { %287 = vmatpush.bf16.msra.mxu1 %v458_v49 }
  0x1d   :  { %191 = vmatpush.bf16.msra.mxu0 %v449_v13 }
  0x1f   :  { %288 = vmatpush.bf16.msra.mxu1 %v457_v50 }
  0x21   :  { %192 = vmatpush.bf16.msra.mxu0 %v448_v14 }
  0x23   :  { %289 = vmatpush.bf16.msra.mxu1 %v456_v51  ;;  %v471_v51 = vld [vmem:[%s671_s5] ss:$0 sm:$0xff] }
  0x25   :  { %193 = vmatpush.bf16.msra.mxu0 %v447_v15 }
  0x27   :  { %290 = vmatpush.bf16.msra.mxu1 %v455_v52 }
  0x29   :  { %194 = vmatpush.bf16.msra.mxu0 %v446_v17 }
  0x2b   :  { %291 = vmatpush.bf16.msra.mxu1 %v454_v53 }
  0x2d   :  { %195 = vmatpush.bf16.msra.mxu0 %v445_v18 }
  0x2f   :  { %292 = vmatpush.bf16.msra.mxu1 %v453_v54 }
  0x83   :  { %v74_v2 = vpop.xlane.xlu0 %73 }
  0x84   :  { %v77_v3 = vmul.f32 0.03125, %v74_v2 }
  0x86   :  { %v79_v4 = vsub.f32 %v641_v0, %v77_v3  ;;  %v87_v16 = vmul.f32 %v77_v3, %v77_v3 }
  0x88   :  { %v81_v5 = vmul.f32 %v79_v4, %v79_v4  ;;  %v89_v19 = vmul.f32 96.0, %v87_v16 }
  0x8a   :  { %83 = vadd.xlane.f32.xlu1 %v81_v5 }
  0x8b   :  { %v76_v6 = vpop.xlane.xlu0 %75 }
  0x8c   :  { %v78_v7 = vmul.f32 0.03125, %v76_v6 }
  0x8e   :  { %v80_v8 = vsub.f32 %v644_v1, %v78_v7  ;;  %v88_v22 = vmul.f32 %v78_v7, %v78_v7 }
  0x90   :  { %v82_v9 = vmul.f32 %v80_v8, %v80_v8  ;;  %v90_v25 = vmul.f32 96.0, %v88_v22 }
  0x92   :  { %85 = vadd.xlane.f32.xlu1 %v82_v9 }
  0xfd   :  { %v84_v20 = vpop.xlane.xlu1 %83 }
  0xfe   :  { %v91_v21 = vsub.f32 %v84_v20, %v89_v19 }
 0x100   :  { %v93_v23 = vmul.f32 0.03125, %v91_v21 }
 0x102   :  { %v95_v24 = vadd.f32 1e-05, %v93_v23 }
 0x104   :  { %472 = vrsqrt.f32 %v95_v24  ;;  %vm103_vm1 = vweird.f32 %v95_v24 }
 0x105   :  { %v86_v26 = vpop.xlane.xlu1 %85 }
 0x106   :  { %v92_v27 = vsub.f32 %v86_v26, %v90_v25 }
 0x108   :  { %v94_v28 = vmul.f32 0.03125, %v92_v27 }
 0x10a   :  { %v473_v29 = vpop.eup %472  ;;  %v96_v30 = vadd.f32 1e-05, %v94_v28 }
 0x10b   :  { %v98_v31 = vmul.f32 %v473_v29, %v95_v24  ;;  %vm104_vm0 = vweird.f32 %v473_v29 }
 0x10c   :  { %474 = vrsqrt.f32 %v96_v30  ;;  %vm105_vm3 = vmor %vm103_vm1, %vm104_vm0  ;;  %vm113_vm4 = vweird.f32 %v96_v30 }
 0x10d   :  { %v99_v32 = vmul.f32 %v473_v29, %v98_v31 }
 0x10f   :  { %v100_v33 = vmul.f32 0.5, %v99_v32 }
 0x111   :  { %v101_v35 = vsub.f32 1.5, %v100_v33 }
 0x112   :  { %v475_v34 = vpop.eup %474 }
 0x113   :  { %v108_v36 = vmul.f32 %v475_v34, %v96_v30  ;;  %v102_v39 = vmul.f32 %v473_v29, %v101_v35  ;;  %vm114_vm2 = vweird.f32 %v475_v34 }
 0x114   :  { %vm115_vm5 = vmor %vm113_vm4, %vm114_vm2 }
 0x115   :  { %v109_v37 = vmul.f32 %v475_v34, %v108_v36  ;;  %v106_v41 = vsel %vm105_vm3, %v473_v29, %v102_v39 }
 0x116   :  { %v117_v44 = vmul.f32 %v106_v41, %v79_v4 }
 0x117   :  { %v110_v38 = vmul.f32 0.5, %v109_v37 }
 0x119   :  { %v111_v40 = vsub.f32 1.5, %v110_v38 }
 0x11b   :  { %v112_v42 = vmul.f32 %v475_v34, %v111_v40 }
 0x11d   :  { %v116_v43 = vsel %vm115_vm5, %v475_v34, %v112_v42 }
 0x11e   :  { %v118_v45 = vmul.f32 %v116_v43, %v80_v8 }
 0x120   :  { %v119_v46 = vpack.c.bf16 %v118_v45, %v117_v44 }
 0x122   :  { %196 = vmatmul.bf16.vlgmr.msra.gmra.mxu0 %v119_v46 }
 0x19f   :  { %v197_v56 = vpop.f32.mrf.mxu0 }
 0x1a0   :  { %v198_v57 = vadd.f32 %v469_v55, %v197_v56 }
 0x1a2   :  { %v204_v58 = vmul.f32 %v198_v57, %v198_v57  ;;  %v202_v11 = vmul.f32 0.5, %v198_v57 }
 0x1a4   :  { %v206_v59 = vmul.f32 %v204_v58, %v198_v57 }
 0x1a6   :  { %v208_v60 = vmul.f32 0.044715, %v206_v59 }
 0x1a7   :  { %v199_v61 = vpop.f32.mrf.mxu0 }
 0x1a8   :  { %v200_v62 = vadd.f32 %v469_v55, %v199_v61  ;;  %v210_v63 = vadd.f32 %v208_v60, %v198_v57 }
 0x1aa   :  { %v205_v2 = vmul.f32 %v200_v62, %v200_v62  ;;  %v212_v4 = vmul.f32 0.7978846, %v210_v63  ;;  %v203_v12 = vmul.f32 0.5, %v200_v62 }
 0x1ac   :  { %v207_v3 = vmul.f32 %v205_v2, %v200_v62  ;;  %476 = vtanh.f32 %v212_v4 }
 0x1ae   :  { %v209_v5 = vmul.f32 0.044715, %v207_v3 }
 0x1b0   :  { %v211_v6 = vadd.f32 %v209_v5, %v200_v62 }
 0x1b2   :  { %v213_v7 = vmul.f32 0.7978846, %v211_v6  ;;  %v477_v8 = vpop.eup %476 }
 0x1b3   :  { %v216_v9 = vadd.f32 1.0, %v477_v8 }
 0x1b4   :  { %478 = vtanh.f32 %v213_v7 }
 0x1b5   :  { %v218_v14 = vmul.f32 %v216_v9, %v202_v11 }
 0x1ba   :  { %v479_v10 = vpop.eup %478 }
 0x1bb   :  { %v217_v13 = vadd.f32 1.0, %v479_v10 }
 0x1bd   :  { %v219_v15 = vmul.f32 %v217_v13, %v203_v12 }
 0x1bf   :  { %v220_v16 = vpack.c.bf16 %v219_v15, %v218_v14 }
 0x1c1   :  { %293 = vmatmul.bf16.vlgmr.msra.gmra.mxu1 %v220_v16 }
 0x23e   :  { %v294_v17 = vpop.f32.mrf.mxu1 }
 0x23f   :  { %v299_v18 = vadd.f32 %v294_v17, %v641_v0 }
 0x241   :  { %301 = vadd.xlane.f32.xlu2 %v299_v18 }
 0x246   :  { %v296_v19 = vpop.f32.mrf.mxu1 }
 0x247   :  { %v300_v20 = vadd.f32 %v296_v19, %v644_v1 }
 0x249   :  { %303 = vadd.xlane.f32.xlu2 %v300_v20 }
 0x2b4   :  { %v302_v21 = vpop.xlane.xlu2 %301 }
 0x2b5   :  { %v305_v22 = vmul.f32 0.03125, %v302_v21 }
 0x2b7   :  { %v307_v23 = vsub.f32 %v299_v18, %v305_v22  ;;  %v315_v29 = vmul.f32 %v305_v22, %v305_v22 }
 0x2b9   :  { %v309_v24 = vmul.f32 %v307_v23, %v307_v23  ;;  %v317_v30 = vmul.f32 96.0, %v315_v29 }
 0x2bb   :  { %311 = vadd.xlane.f32.xlu0 %v309_v24 }
 0x2bc   :  { %v304_v25 = vpop.xlane.xlu2 %303 }
 0x2bd   :  { %v306_v26 = vmul.f32 0.03125, %v304_v25 }
 0x2bf   :  { %v308_v27 = vsub.f32 %v300_v20, %v306_v26  ;;  %v316_v0 = vmul.f32 %v306_v26, %v306_v26 }
 0x2c1   :  { %v310_v28 = vmul.f32 %v308_v27, %v308_v27  ;;  %v318_v35 = vmul.f32 96.0, %v316_v0 }
 0x2c3   :  { %313 = vadd.xlane.f32.xlu1 %v310_v28 }
 0x32e   :  { %v312_v31 = vpop.xlane.xlu0 %311 }
 0x32f   :  { %v319_v32 = vsub.f32 %v312_v31, %v317_v30 }
 0x331   :  { %v321_v33 = vmul.f32 0.03125, %v319_v32 }
 0x333   :  { %v323_v34 = vadd.f32 1e-05, %v321_v33 }
 0x335   :  { %480 = vrsqrt.f32 %v323_v34  ;;  %vm331_vm7 = vweird.f32 %v323_v34 }
 0x336   :  { %v314_v1 = vpop.xlane.xlu1 %313 }
 0x337   :  { %v320_v36 = vsub.f32 %v314_v1, %v318_v35 }
 0x339   :  { %v322_v37 = vmul.f32 0.03125, %v320_v36 }
 0x33b   :  { %v481_v38 = vpop.eup %480  ;;  %v324_v39 = vadd.f32 1e-05, %v322_v37 }
 0x33c   :  { %v326_v40 = vmul.f32 %v481_v38, %v323_v34  ;;  %vm332_vm6 = vweird.f32 %v481_v38 }
 0x33d   :  { %482 = vrsqrt.f32 %v324_v39  ;;  %vm333_vm8 = vmor %vm331_vm7, %vm332_vm6  ;;  %vm341_vm10 = vweird.f32 %v324_v39 }
 0x33e   :  { %v327_v41 = vmul.f32 %v481_v38, %v326_v40 }
 0x340   :  { %v328_v42 = vmul.f32 0.5, %v327_v41 }
 0x342   :  { %v329_v43 = vsub.f32 1.5, %v328_v42 }
 0x343   :  { %v483_v44 = vpop.eup %482 }
 0x344   :  { %v330_v45 = vmul.f32 %v481_v38, %v329_v43  ;;  %v336_v46 = vmul.f32 %v483_v44, %v324_v39  ;;  %vm342_vm9 = vweird.f32 %v483_v44 }
 0x345   :  { %vm343_vm11 = vmor %vm341_vm10, %vm342_vm9 }
 0x346   :  { %v334_v48 = vsel %vm333_vm8, %v481_v38, %v330_v45  ;;  %v337_v49 = vmul.f32 %v483_v44, %v336_v46 }
 0x347   :  { %v345_v50 = vmul.f32 %v334_v48, %v307_v23 }
 0x348   :  { %v338_v52 = vmul.f32 0.5, %v337_v49 }
 0x349   :  { %v351_v53 = vmul.f32 %v470_v47, %v345_v50 }
 0x34a   :  { %v339_v54 = vsub.f32 1.5, %v338_v52 }
 0x34b   :  { %v357_v55 = vadd.f32 %v471_v51, %v351_v53 }
 0x34c   :  { %v340_v56 = vmul.f32 %v483_v44, %v339_v54 }
 0x34d   :  { %359 = vst [vmem:[#allocation8] sm:$0xff] %v357_v55 }
 0x34e   :  { %v344_v57 = vsel %vm343_vm11, %v483_v44, %v340_v56 }
 0x34f   :  { %v346_v58 = vmul.f32 %v344_v57, %v308_v27 }
 0x351   :  { %v352_v59 = vmul.f32 %v470_v47, %v346_v58 }
 0x353   :  { %v358_v60 = vadd.f32 %v471_v51, %v352_v59 }
 0x355   :  { %360 = vst [vmem:[#allocation8 + $0x8] sm:$0xff] %v358_v60 }
 0x356   :  { %373 = dma.vmem_to_hbm [thread:$0]  %s366_s4, 256, %s368_s21, [#allocation4], %s590_s9, %s590_s9, %s591_s10  }
 0x357   :  { %584 = dma.done.wait [#allocation4], 256  }
 0x358   :  { %585 = vsyncadd [#allocation4], 4294967040 }
 0x359   :  { %378 = vsyncpa [#allocation3], 1 }
 0x35a   :  { %379 = vsyncpa [#allocation6], 1 }
 0x35b   :  { %380 = vsyncpa [#allocation4], 1 }

</bundles_post_ra>
